<compile_context>
chip_gen: v7x
topology: tpu7x:2x2x1
jax: 0.10.0
libtpu: 0.0.40
codegen_flags: <defaults>
</compile_context>

<pallas_src>
import numpy as np
import jax
import jax.numpy as jnp
from jax.experimental import pallas as pl
from jax.experimental.pallas import tpu as pltpu


# ----------------------------- Pallas kernel --------------------------------
def contract_cp_kernel(x_ref, emb_ref, finT_ref, fsp_ref, fout_ref, o_ref):
    # x_ref   : (C_in, L)   batch-flattened lanes, L = Bt * N
    # emb_ref : (1, L)      hoisted Dense_0(silu(temb)), flattened the same way
    # finT_ref: (R, C_in)   input-channel factor, pre-transposed
    # fsp_ref : (R, L)      spatial factor * cp_weights, tiled over the Bt block
    # fout_ref: (C_out, R)  output-channel factor
    # o_ref   : (C_out, L)
    x = x_ref[...] + emb_ref[...]                              # bcast over C_in rows
    y = jnp.dot(finT_ref[...], x,
                preferred_element_type=jnp.float32)            # (R, L)
    z = y * fsp_ref[...]                                       # per-rank/mode scale
    o_ref[...] = jnp.dot(fout_ref[...], z,
                         preferred_element_type=jnp.float32)   # (C_out, L)


def _pick_batch_block(B, N, target_lanes=4096):
    """Pick a batch-block size Bt (dividing B) so the flattened lane extent
    Bt*N is as wide as possible (lane-dense stores / wide MXU N), while still
    tileable when B*N is large."""
    if B * N <= target_lanes:
        return B                      # whole batch in one step, full-extent block
    for bt in range(B, 0, -1):
        if B % bt == 0 and (bt * N) % 128 == 0 and bt * N <= target_lanes:
            return bt
    return B                          # fallback: single full-extent block


def contract_cp_pallas(x, temb, w_dense, b_dense, cp_weights, f_in, f_out, f_sp,
                       bt=None):
    """x: (B, C_in, N), temb: (B, Td), w_dense: (N, Td) [PyTorch Linear layout],
    b_dense: (N,), cp_weights: (R,), f_in: (C_in, R), f_out: (C_out, R),
    f_sp: (N, R).  Returns (B, C_out, N) float32."""
    B, C_in, N = x.shape
    R = cp_weights.shape[0]
    C_out = f_out.shape[0]
    hidden = w_dense.shape[0]
    assert hidden == N, (
        "Dense_0 hidden width must equal spatial size N for the [:, None] "
        "broadcast in the original module")

    # --- hoisted time-embedding projection (one batched XLA matmul) ---------
    t_act = temb * jax.nn.sigmoid(temb)                    # SiLU, f32
    emb = t_act @ w_dense.T + b_dense                      # (B, N)

    # --- re-layout to a lane-dense (C_in, B*N) slab -------------------------
    x2 = jnp.transpose(x, (1, 0, 2)).reshape(C_in, B * N)  # col = b*N + n
    emb_flat = emb.reshape(1, B * N)

    # --- fold cp_weights into the spatial factor; pre-transpose -------------
    finT = f_in.T                                          # (R, C_in)
    fspT_scaled = cp_weights[:, None] * f_sp.T             # (R, N)

    if bt is None:
        bt = _pick_batch_block(B, N)
    assert B % bt == 0
    L = bt * N
    fsp_tiled = jnp.tile(fspT_scaled, (1, bt))             # (R, L), col = b*N + n

    grid = (B // bt,)

    # cost hint for XLA scheduling around the custom call
    flops = 2 * B * N * R * (C_in + C_out) + B * N * (C_in + R)
    bytes_accessed = 4 * (x2.size + emb_flat.size + finT.size +
                          fsp_tiled.size + f_out.size + C_out * B * N)
    cost = pl.CostEstimate(flops=flops, transcendentals=0,
                           bytes_accessed=bytes_accessed)

    # VMEM budget: double-buffered x/emb/out blocks + resident factors (+slack)
    vmem_needed = 4 * (2 * C_in * L + 2 * L + 2 * C_out * L +
                       R * C_in + R * L + C_out * R)
    vmem_limit = int(min(64 * 1024 * 1024, max(4 * vmem_needed, 4 * 1024 * 1024)))

    out2 = pl.pallas_call(
        contract_cp_kernel,
        out_shape=jax.ShapeDtypeStruct((C_out, B * N), jnp.float32),
        grid_spec=pltpu.PrefetchScalarGridSpec(
            num_scalar_prefetch=0,
            grid=grid,
            in_specs=[
                pl.BlockSpec((C_in, L),  lambda a: (0, a)),   # x slab
                pl.BlockSpec((1, L),     lambda a: (0, a)),   # emb slab
                pl.BlockSpec((R, C_in),  lambda a: (0, 0)),   # F_in^T (resident)
                pl.BlockSpec((R, L),     lambda a: (0, 0)),   # w*F_sp^T tiled
                pl.BlockSpec((C_out, R), lambda a: (0, 0)),   # F_out (resident)
            ],
            out_specs=pl.BlockSpec((C_out, L), lambda a: (0, a)),
        ),
        compiler_params=pltpu.CompilerParams(
            dimension_semantics=("parallel",),
            vmem_limit_bytes=vmem_limit),
        cost_estimate=cost,
    )(x2, emb_flat, finT, fsp_tiled, f_out)

    # un-flatten: (C_out, B*N) -> (B, C_out, N)
    return jnp.transpose(out2.reshape(C_out, B, N), (1, 0, 2))


# ------------------------- deterministic parameter init ---------------------
def default_init_uniform(key, shape, scale=1.0):
    """DDPM default_init: variance_scaling(scale, 'fan_avg', 'uniform')
    for a PyTorch Linear weight of shape (out, in)."""
    fan_out, fan_in = shape[0], shape[1]
    variance = scale / ((fan_in + fan_out) / 2.0)
    bound = np.sqrt(3.0 * variance)
    return jax.random.uniform(key, shape, jnp.float32, -bound, bound)


# ------------------------------ reference (pure JAX) -------------------------
def contract_cp_reference(x, temb, w_dense, b_dense, cp_weights, f_in, f_out, f_sp):
    t_act = temb * jax.nn.sigmoid(temb)
    emb = t_act @ w_dense.T + b_dense                  # (B, N)  (hidden == N)
    x = x + emb[:, None, :]                            # literal [:, None] broadcast
    # eq = "abc,d,bd,ed,cd->aec"
    return jnp.einsum('abc,d,bd,ed,cd->aec', x, cp_weights, f_in, f_out, f_sp)


if __name__ == "__main__":
    # Small shapes consistent with the module: order-3 input (B, C_in, N),
    # hidden == N so that Dense_0(act(temb))[:, None] broadcasts onto x.
    B, C_in, C_out, N, Td, R = 2, 4, 6, 16, 8, 8
    hidden = N

    key = jax.random.PRNGKey(0)
    k_x, k_t, k_wd, k_cw, k_fi, k_fo, k_fs = jax.random.split(key, 7)

    x = jax.random.normal(k_x, (B, C_in, N), jnp.float32)
    temb = jax.random.normal(k_t, (B, Td), jnp.float32)

    # Dense_0: Linear(Td, hidden) with default_init weight, zero bias.
    w_dense = default_init_uniform(k_wd, (hidden, Td))
    b_dense = jnp.zeros((hidden,), jnp.float32)

    # CP factorization parameters (synthetic, deterministic).
    cp_weights = jax.random.normal(k_cw, (R,), jnp.float32)
    f_in = jax.random.normal(k_fi, (C_in, R), jnp.float32) * 0.1
    f_out = jax.random.normal(k_fo, (C_out, R), jnp.float32) * 0.1
    f_sp = jax.random.normal(k_fs, (N, R), jnp.float32) * 0.1

    # TODO(synk): real FNO spectral conv applies this to complex Fourier
    # coefficients; kernel is implemented for real float32 coefficients.

    out = contract_cp_pallas(x, temb, w_dense, b_dense,
                             cp_weights, f_in, f_out, f_sp)
    out = jax.block_until_ready(out)

    ref = contract_cp_reference(x, temb, w_dense, b_dense,
                                cp_weights, f_in, f_out, f_sp)
    ref = jax.block_until_ready(ref)

    assert out.shape == (B, C_out, N)
    np.testing.assert_allclose(np.asarray(out), np.asarray(ref),
                               rtol=1e-5, atol=1e-5)
    print("KERNEL_OK")
</pallas_src>

<mosaic_0001>
module attributes {stable_mosaic.version = 11 : i64} {
  func.func @contract_cp_kernel(%arg0: i32, %arg1: memref<4x32xf32, #tpu.memory_space<vmem>>, %arg2: memref<1x32xf32, #tpu.memory_space<vmem>>, %arg3: memref<8x4xf32, #tpu.memory_space<vmem>>, %arg4: memref<8x32xf32, #tpu.memory_space<vmem>>, %arg5: memref<6x8xf32, #tpu.memory_space<vmem>>, %arg6: memref<6x32xf32, #tpu.memory_space<vmem>>) attributes {dimension_semantics = [#tpu.dimension_semantics<parallel>], iteration_bounds = array<i64: 1>, scalar_prefetch = 0 : i64, scratch_operands = 0 : i64, tpu.core_type = #tpu.core_type<tc>, window_params = [{transform_indices = @transform_0, window_bounds = array<i64: 4, 32>}, {transform_indices = @transform_1, window_bounds = array<i64: 1, 32>}, {pipeline_mode = #tpu.pipeline_mode<synchronous>, transform_indices = @transform_2, window_bounds = array<i64: 8, 4>}, {pipeline_mode = #tpu.pipeline_mode<synchronous>, transform_indices = @transform_3, window_bounds = array<i64: 8, 32>}, {pipeline_mode = #tpu.pipeline_mode<synchronous>, transform_indices = @transform_4, window_bounds = array<i64: 6, 8>}, {transform_indices = @transform_5, window_bounds = array<i64: 6, 32>}]} {
    %c0 = arith.constant 0 : index
    %c0_0 = arith.constant 0 : index
    %0 = vector.load %arg1[%c0, %c0_0] : memref<4x32xf32, #tpu.memory_space<vmem>>, vector<4x32xf32>
    %c0_1 = arith.constant 0 : index
    %c0_2 = arith.constant 0 : index
    %1 = vector.load %arg2[%c0_1, %c0_2] : memref<1x32xf32, #tpu.memory_space<vmem>>, vector<1x32xf32>
    %2 = vector.broadcast %1 : vector<1x32xf32> to vector<4x32xf32>
    %3 = arith.addf %0, %2 : vector<4x32xf32>
    %c0_3 = arith.constant 0 : index
    %c0_4 = arith.constant 0 : index
    %4 = vector.load %arg3[%c0_3, %c0_4] : memref<8x4xf32, #tpu.memory_space<vmem>>, vector<8x4xf32>
    %cst = arith.constant dense<0.000000e+00> : vector<8x32xf32>
    %5 = tpu.matmul %4, %3, %cst {dimension_numbers = #tpu.dot_dimension_numbers<[1], [0], [0], [1], [0, 0, 1, 1], [], []>} : vector<8x4xf32>, vector<4x32xf32>, vector<8x32xf32> -> vector<8x32xf32>
    %c0_5 = arith.constant 0 : index
    %c0_6 = arith.constant 0 : index
    %6 = vector.load %arg4[%c0_5, %c0_6] : memref<8x32xf32, #tpu.memory_space<vmem>>, vector<8x32xf32>
    %7 = arith.mulf %5, %6 : vector<8x32xf32>
    %c0_7 = arith.constant 0 : index
    %c0_8 = arith.constant 0 : index
    %8 = vector.load %arg5[%c0_7, %c0_8] : memref<6x8xf32, #tpu.memory_space<vmem>>, vector<6x8xf32>
    %cst_9 = arith.constant dense<0.000000e+00> : vector<6x32xf32>
    %9 = tpu.matmul %8, %7, %cst_9 {dimension_numbers = #tpu.dot_dimension_numbers<[1], [0], [0], [1], [0, 0, 1, 1], [], []>} : vector<6x8xf32>, vector<8x32xf32>, vector<6x32xf32> -> vector<6x32xf32>
    %c0_10 = arith.constant 0 : index
    %c0_11 = arith.constant 0 : index
    %10 = vector.load %arg6[%c0_10, %c0_11] : memref<6x32xf32, #tpu.memory_space<vmem>>, vector<6x32xf32>
    tpu.vector_store %arg6[%c0_10, %c0_11], %9 {strides = array<i32>} : memref<6x32xf32, #tpu.memory_space<vmem>>, vector<6x32xf32>,
    return
  }
  func.func @transform_0(%arg0: i32) -> (i32, i32) {
    %c0_i32 = arith.constant 0 : i32
    %c0_i32_0 = arith.constant 0 : i32
    return %c0_i32, %arg0 : i32, i32
  }
  func.func @transform_1(%arg0: i32) -> (i32, i32) {
    %c0_i32 = arith.constant 0 : i32
    %c0_i32_0 = arith.constant 0 : i32
    return %c0_i32, %arg0 : i32, i32
  }
  func.func @transform_2(%arg0: i32) -> (i32, i32) {
    %c0_i32 = arith.constant 0 : i32
    %c0_i32_0 = arith.constant 0 : i32
    %c0_i32_1 = arith.constant 0 : i32
    return %c0_i32, %c0_i32_0 : i32, i32
  }
  func.func @transform_3(%arg0: i32) -> (i32, i32) {
    %c0_i32 = arith.constant 0 : i32
    %c0_i32_0 = arith.constant 0 : i32
    %c0_i32_1 = arith.constant 0 : i32
    return %c0_i32, %c0_i32_0 : i32, i32
  }
  func.func @transform_4(%arg0: i32) -> (i32, i32) {
    %c0_i32 = arith.constant 0 : i32
    %c0_i32_0 = arith.constant 0 : i32
    %c0_i32_1 = arith.constant 0 : i32
    return %c0_i32, %c0_i32_0 : i32, i32
  }
  func.func @transform_5(%arg0: i32) -> (i32, i32) {
    %c0_i32 = arith.constant 0 : i32
    %c0_i32_0 = arith.constant 0 : i32
    return %c0_i32, %arg0 : i32, i32
  }
}

</mosaic_0001>

<bundles_post_ra>
// kernel: tpu_custom_call.1
= control target key start
LH: loop header
LB: loop body
LE: loop exit
PB: predicated region body
PF: predicated region fallthrough
CT: control target
= control target key end

     0   :  { %10 = vsyncpa [#allocation3], 0  ;;  %s355_s0 = inlined_call_operand.hbm [shape: f32[4,32], index: 0, kind: input, shape index: {}]   ;;  %s356_s1 = inlined_call_operand.vmem [shape: f32[1,32], index: 1, kind: input, shape index: {}]   ;;  %s357_s2 = inlined_call_operand.vmem [shape: f32[8,4], index: 2, kind: input, shape index: {}]   ;;  %s358_s3 = inlined_call_operand.vmem [shape: f32[8,32], index: 3, kind: input, shape index: {}]   ;;  %s359_s4 = inlined_call_operand.vmem [shape: f32[6,8], index: 4, kind: input, shape index: {}]   ;;  %s360_s5 = inlined_call_operand.hbm [shape: f32[6,32], index: 5, kind: output, shape index: {}]  }
   0x1   :  { %11 = vsyncpa [#allocation4], 0  ;;  %s285_s18 = smov [#allocation2]   ;;  %s237_s22 = scalar_lea.hbm %s355_s0, 64 }
   0x2   :  { %s18_s19 = sshll.u32 %s285_s18, 4  ;;  %p238_p0 = scmp.ne.s32.totalorder %s355_s0, %s237_s22  ;;  %s19_s19 = int_to_ptr.vmem [resolvable:$true] %s18_s19 }
   0x3   :  { %p241_p1 = scmp.lt.u32.totalorder %s237_s22, %s355_s0 }
   0x5   :  { %p243_p2 = pnand %p241_p1, %p238_p0 }
   0x7   :  { %246 = shalt.err (!%p243_p2)
}
   0x8   :  { %s247_s27 = scalar_lea.vmem %s19_s19, 64  ;;  %p252_p4 = scmp.lt.s32.totalorder %s19_s19, %s19_s19 }
   0x9   :  { %p248_p3 = scmp.ne.s32.totalorder %s19_s19, %s247_s27  ;;  %p253_p5 = scmp.lt.s32.totalorder %s247_s27, %s247_s27 }
   0xb   :  { %p254_p6 = por %p253_p5, %p252_p4 }
   0xd   :  { %p255_p7 = pnand %p254_p6, %p248_p3 }
   0xf   :  { %258 = shalt.err (!%p255_p7)
}
  0x10   :  { %21 = dma.hbm_to_vmem [thread:$0]  %s355_s0, 64, %s19_s19, [#allocation3]  }
  0x11   :  { %281 = dma.done.wait [#allocation3], 64  }
  0x12   :  { %282 = vsyncadd [#allocation3], 4294967232  ;;  %v286_v0 = vmov 0.0   ;;  %vm287_vm0 = vmmov 0   ;;  %v33_v1 = vld [vmem:[#allocation2] sm:$0xf] }
  0x13   :  { %223 = vmatprep.subr.mxu0 %v286_v0  ;;  %225 = vmatprep.mubr.msk.f32.mxu0 %vm287_vm0, %v286_v0  ;;  %v215_v2 = vld [vmem:[%s356_s1] ss:$0 sm:$0xff]  ;;  %vm47_vm1 = vcmask 1043456   ;;  %vm43_vm2 = vcmask 31744   ;;  %vm124_vm3 = vcmask 64512   ;;  %s288_s1 = smov [#allocation5]  }
  0x14   :  { %228 = vmatprep.subr.mxu1 %v286_v0  ;;  %230 = vmatprep.mubr.msk.f32.mxu1 %vm287_vm0, %v286_v0  ;;  %v41_v3 = vadd.f32 %v215_v2, %v33_v1  ;;  %v42_v4 = vld [vmem:[%s357_s2] sm:$0xff]  ;;  %s206_s12 = sshll.u32 %s288_s1, 4  ;;  %vm198_vm4 = vcmask 259072   ;;  %s207_s12 = int_to_ptr.vmem [resolvable:$true] %s206_s12 }
  0x15   :  { %v121_v5 = vld [vmem:[%s358_s3] sm:$0xff]  ;;  %s259_s2 = scalar_lea.vmem %s207_s12, 128  ;;  %p264_p9 = scmp.lt.s32.totalorder %s207_s12, %s207_s12 }
  0x16   :  { %224 = vmatpush3.msk.msra.mxu0 %vm47_vm1, %v41_v3  ;;  %v123_v9 = vld [vmem:[%s359_s4] sm:$0x3f]  ;;  %p260_p8 = scmp.ne.s32.totalorder %s207_s12, %s259_s2  ;;  %p265_p10 = scmp.lt.s32.totalorder %s259_s2, %s259_s2 }
  0x17   :  { %226 = vmatmul.mubr.msk.f32.vlgmr.msra.gmra.mrb[0].mxu0 %vm43_vm2, %v42_v4 }
  0x18   :  { %p266_p11 = por %p265_p10, %p264_p9 }
  0x1a   :  { %p267_p12 = pnand %p266_p11, %p260_p8 }
  0xea   :  { %v117_v6 = vpop.f32.mrb[0].mxu0 }
  0xeb   :  { %v122_v7 = vmul.f32 %v121_v5, %v117_v6  ;;  %v227_v8 = vpop.f32.mrb[1].mxu0 }
  0xed   :  { %229 = vmatpush3.msra.mxu1 %v122_v7 }
  0xee   :  { %231 = vmatmul.mubr.msk.f32.vlgmr.msra.gmra.mrb[0].mxu1 %vm124_vm3, %v123_v9 }
 0x1c1   :  { %v194_v10 = vpop.f32.mrb[0].mxu1 }
 0x1c2   :  { %v232_v11 = vpop.f32.mrb[1].mxu1  ;;  %199 = vst.msk [vmem:[#allocation5] sm:$0x3f] %vm198_vm4, %v194_v10 }
 0x1c3   :  { %270 = shalt.err (!%p267_p12)
}
 0x1c4   :  { %s271_s4 = scalar_lea.hbm %s360_s5, 128 }
 0x1c5   :  { %p272_p13 = scmp.ne.s32.totalorder %s360_s5, %s271_s4  ;;  %p275_p0 = scmp.lt.u32.totalorder %s271_s4, %s360_s5 }
 0x1c7   :  { %p277_p1 = pnand %p275_p0, %p272_p13 }
 0x1c9   :  { %280 = shalt.err (!%p277_p1)
}
 0x1ca   :  { %209 = dma.vmem_to_hbm [thread:$0]  %s207_s12, 128, %s360_s5, [#allocation4]  }
 0x1cb   :  { %283 = dma.done.wait [#allocation4], 128  }
 0x1cc   :  { %284 = vsyncadd [#allocation4], 4294967168 }
 0x1cd   :  { %213 = vsyncpa [#allocation3], 1 }
 0x1ce   :  { %214 = vsyncpa [#allocation4], 1 }

</bundles_post_ra>
